<compile_context>
chip_gen: v7x
topology: tpu7x:2x2x1
jax: 0.10.0
libtpu: 0.0.40
codegen_flags: <defaults>
</compile_context>

<pallas_src>
import functools

import jax
import jax.numpy as jnp
from jax.experimental import pallas as pl
from jax.experimental.pallas import tpu as pltpu


def _round_up(x, m):
    return (x + m - 1) // m * m


def ffn_kernel(x_ref, w1_ref, b1_ref, w2_ref, b2_ref, o_ref, acc_ref=None, *,
               tp, weights_resident):
    """One (row-tile, pf-chunk) step of  y = relu(x @ W1 + b1) @ W2 + b2.

    weights_resident=True : w1/b1/w2 refs hold the FULL arrays (resident in
                            VMEM); this step's pf-chunk is sliced with pl.ds.
    weights_resident=False: w1/b1/w2 refs already hold this step's pf-chunk.
    acc_ref is None        : o_ref is f32 and doubles as the accumulator.
    """
    p = pl.program_id(1)
    acc = o_ref if acc_ref is None else acc_ref

    if weights_resident:
        s = p * tp
        if tp % 128 == 0:
            s = pl.multiple_of(s, 128)          # aligned lane/sublane slices
        w1 = w1_ref[:, pl.ds(s, tp)]
        b1 = b1_ref[:, pl.ds(s, tp)]
        w2 = w2_ref[pl.ds(s, tp), :]
    else:
        w1 = w1_ref[...]
        b1 = b1_ref[...]
        w2 = w2_ref[...]

    @pl.when(p == 0)
    def _():
        if acc_ref is None:
            # Seed the in-place f32 accumulator with the fc_2 bias: saves both
            # the scratch buffer and the epilogue read-modify-write copy.
            acc[...] = jnp.broadcast_to(b2_ref[...].astype(jnp.float32),
                                        acc.shape)
        else:
            acc[...] = jnp.zeros_like(acc)

    # fc_1 chunk on the MXU (f32 accumulation); bias-add + ReLU in f32 on VPU.
    h = jnp.dot(x_ref[...], w1, preferred_element_type=jnp.float32)
    h = jnp.maximum(h + b1, 0.0)
    # Dropout: inference mode -> identity.

    # fc_2 partial product for this pf-chunk, accumulated in f32.
    # Mixed-precision contract: h is cast to the input dtype for MXU rate.
    acc[...] += jnp.dot(h.astype(x_ref.dtype), w2,
                        preferred_element_type=jnp.float32)

    if acc_ref is not None:
        @pl.when(p == pl.num_programs(1) - 1)
        def _():
            o_ref[...] = (acc_ref[...] + b2_ref[...]).astype(o_ref.dtype)


def _pick_tile_p(P, tile_p, H, wbytes, chunk_budget=None):
    """Largest 128-multiple divisor of P that is <= tile_p (and, for the
    streaming path, whose double-buffered W1+W2 chunks fit chunk_budget)."""
    if P % 128 != 0:
        return P                                 # odd P: single full chunk
    best = 128
    for c in range(128, P + 1, 128):
        if P % c:
            continue
        if c > tile_p:
            continue
        if chunk_budget is not None and 2 * (2 * H * c) * wbytes > chunk_budget:
            continue
        best = c
    return best


def positionwise_feedforward(x, w1, b1, w2, b2, *, tile_m=512, tile_p=512,
                             vmem_limit_bytes=None, compute_dtype=None,
                             force_streaming=False):
    """y = relu(x @ W1 + b1) @ W2 + b2   (dropout = eval-mode identity).

    x: [B, S, H]; w1: [H, P]; b1: [P]; w2: [P, H]; b2: [H]  ->  [B, S, H].
    For production shapes pass bf16 operands (or set compute_dtype=jnp.bfloat16
    to cast here): f32 matmuls run far below MXU peak on all TPU generations;
    f32 accumulation is kept inside the kernel either way.
    """
    B, S, H = x.shape
    P = w1.shape[1]
    M = B * S
    out_dtype = x.dtype

    if compute_dtype is not None:
        x, w1, b1, w2, b2 = (a.astype(compute_dtype) for a in (x, w1, b1, w2, b2))

    x2d = x.reshape(M, H)
    b1_2d = b1.reshape(1, P)
    b2_2d = b2.reshape(1, H)

    # Row tile: amortize per-step overhead; pad M up rather than shrinking the
    # tile so every instance stays on the unmasked load/store path.
    tm = min(tile_m, _round_up(M, 8))
    Mp = _round_up(M, tm)
    if Mp != M:
        x2d = jnp.pad(x2d, ((0, Mp - M), (0, 0)))

    xbytes = x2d.dtype.itemsize
    wbytes = w1.dtype.itemsize

    # VMEM budget: ~3/4 of this chip's VMEM, capped at 96 MiB
    # (=> ~48 MiB on v7x's 64 MiB/TC, ~96 MiB on v5e/v6e's 128 MiB).
    if vmem_limit_bytes is None:
        try:
            cap = pltpu.get_tpu_info().vmem_capacity_bytes
        except Exception:
            cap = 64 * 1024 * 1024               # assume smallest (v7x-sized)
        vmem_limit_bytes = int(min(cap * 3 // 4, 96 * 1024 * 1024))

    # Streaming-side VMEM: double-buffered x/out row tiles, f32 accumulator,
    # and the fc_1 intermediate.
    act_bytes = (2 * 2 * tm * H * xbytes + tm * H * 4
                 + tm * min(tile_p, P) * 4)
    # Weight-residency decision (conservatively assume default double
    # buffering even though we request pl.Buffered(1) for resident blocks).
    resident_bytes = 2 * (2 * H * P + P + H) * wbytes
    weights_resident = (not force_streaming
                        and resident_bytes + act_bytes <= vmem_limit_bytes)

    if weights_resident:
        tp = _pick_tile_p(P, tile_p, H, wbytes)
    else:
        tp = _pick_tile_p(P, tile_p, H, wbytes,
                          chunk_budget=max(vmem_limit_bytes - act_bytes,
                                           vmem_limit_bytes // 4))
    n_m, n_p = Mp // tm, P // tp

    # f32 output: accumulate straight into the (resident-over-p) output block.
    acc_in_out = x2d.dtype == jnp.float32
    scratch = [] if acc_in_out else [pltpu.VMEM((tm, H), jnp.float32)]

    kernel = functools.partial(ffn_kernel, tp=tp,
                               weights_resident=weights_resident)

    def run(weight_mode):
        def wspec(shape, imap):
            if weight_mode is None:
                return pl.BlockSpec(shape, imap)
            return pl.BlockSpec(shape, imap, pipeline_mode=weight_mode)

        if weights_resident:
            in_specs = [
                pl.BlockSpec((tm, H), lambda i, p: (i, 0)),   # x tile (streams)
                wspec((H, P), lambda i, p: (0, 0)),           # W1 (resident)
                wspec((1, P), lambda i, p: (0, 0)),           # b1 (resident)
                wspec((P, H), lambda i, p: (0, 0)),           # W2 (resident)
                wspec((1, H), lambda i, p: (0, 0)),           # b2 (resident)
            ]
        else:
            in_specs = [
                pl.BlockSpec((tm, H), lambda i, p: (i, 0)),   # x tile (streams)
                pl.BlockSpec((H, tp), lambda i, p: (0, p)),   # W1 pf-chunk
                pl.BlockSpec((1, tp), lambda i, p: (0, p)),   # b1 pf-chunk
                pl.BlockSpec((tp, H), lambda i, p: (p, 0)),   # W2 pf-chunk
                wspec((1, H), lambda i, p: (0, 0)),           # b2 (resident)
            ]

        return pl.pallas_call(
            kernel,
            out_shape=jax.ShapeDtypeStruct((Mp, H), x2d.dtype),
            grid=(n_m, n_p),
            in_specs=in_specs,
            out_specs=pl.BlockSpec((tm, H), lambda i, p: (i, 0)),
            scratch_shapes=scratch,
            compiler_params=pltpu.CompilerParams(
                dimension_semantics=("parallel", "arbitrary"),
                vmem_limit_bytes=vmem_limit_bytes),
        )(x2d, w1, b1_2d, w2, b2_2d)

    try:
        # Constant-index (resident) blocks only need a single VMEM buffer.
        out2d = run(pl.Buffered(1))
    except Exception:
        # pipeline_mode / Buffered(1) unsupported on this jax version: default
        # double buffering (the residency budget above already assumed 2x).
        out2d = run(None)

    return out2d[:M].reshape(B, S, H).astype(out_dtype)


def _ffn_ref(x, w1, b1, w2, b2):
    return jnp.maximum(x @ w1 + b1, 0.0) @ w2 + b2


if __name__ == "__main__":
    # Small but lane-dense shapes (H, P multiples of 128), consistent with the
    # decoder's positionwise feed-forward (P = 4 * H).
    hid_dim, pf_dim = 128, 512
    dropout_p = 0.1  # eval-mode dropout -> identity (unused)

    key = jax.random.PRNGKey(0)
    kx, k1, kb1, k2, kb2, kx2 = jax.random.split(key, 6)

    # PyTorch nn.Linear stores weight as (out, in); passed here as (in, out).
    w1 = jax.random.normal(k1, (hid_dim, pf_dim), dtype=jnp.float32) * 0.05
    b1 = jax.random.normal(kb1, (pf_dim,), dtype=jnp.float32) * 0.05
    w2 = jax.random.normal(k2, (pf_dim, hid_dim), dtype=jnp.float32) * 0.05
    b2 = jax.random.normal(kb2, (hid_dim,), dtype=jnp.float32) * 0.05

    # Case 1: f32, resident weights, pf-dim chunked (2 x 256), output block
    # doubles as the f32 accumulator (no scratch).
    batch, seq = 2, 8
    x = jax.random.normal(kx, (batch, seq, hid_dim), dtype=jnp.float32)
    out = jax.block_until_ready(
        positionwise_feedforward(x, w1, b1, w2, b2, tile_p=256))
    ref = _ffn_ref(x, w1, b1, w2, b2)
    assert out.shape == (batch, seq, hid_dim)
    assert jnp.allclose(out, ref, atol=1e-5, rtol=1e-5)

    # Case 2: row count not a multiple of 8 -> wrapper M-padding; n_p == 1.
    batch2, seq2 = 3, 7
    x2 = jax.random.normal(kx2, (batch2, seq2, hid_dim), dtype=jnp.float32)
    out2 = jax.block_until_ready(positionwise_feedforward(x2, w1, b1, w2, b2))
    ref2 = _ffn_ref(x2, w1, b1, w2, b2)
    assert out2.shape == (batch2, seq2, hid_dim)
    assert jnp.allclose(out2, ref2, atol=1e-5, rtol=1e-5)

    # Case 3: bf16 operands feed the MXU at full rate (f32 scratch accumulator).
    outb = jax.block_until_ready(positionwise_feedforward(
        x.astype(jnp.bfloat16),
        w1.astype(jnp.bfloat16), b1.astype(jnp.bfloat16),
        w2.astype(jnp.bfloat16), b2.astype(jnp.bfloat16), tile_p=256))
    assert outb.dtype == jnp.bfloat16
    assert jnp.allclose(outb.astype(jnp.float32), ref, atol=5e-2, rtol=5e-2)

    # Case 4: wrapper-side bf16 cast for f32 callers (compute_dtype).
    outc = jax.block_until_ready(positionwise_feedforward(
        x, w1, b1, w2, b2, compute_dtype=jnp.bfloat16))
    assert outc.dtype == jnp.float32
    assert jnp.allclose(outc, ref, atol=5e-2, rtol=5e-2)

    # Case 5: weight-streaming fallback path (used when W1/W2 exceed the VMEM
    # budget, e.g. H=2048, P=8192 bf16 on v7x's 64 MiB VMEM).
    outs = jax.block_until_ready(positionwise_feedforward(
        x, w1, b1, w2, b2, tile_p=256, force_streaming=True))
    assert jnp.allclose(outs, ref, atol=1e-5, rtol=1e-5)

    print("KERNEL_OK")
</pallas_src>

<mosaic_0001>
module attributes {stable_mosaic.version = 11 : i64} {
  func.func @ffn_kernel(%arg0: i32, %arg1: i32, %arg2: memref<16x128xf32, #tpu.memory_space<vmem>>, %arg3: memref<128x512xf32, #tpu.memory_space<vmem>>, %arg4: memref<1x512xf32, #tpu.memory_space<vmem>>, %arg5: memref<512x128xf32, #tpu.memory_space<vmem>>, %arg6: memref<1x128xf32, #tpu.memory_space<vmem>>, %arg7: memref<16x128xf32, #tpu.memory_space<vmem>>) attributes {dimension_semantics = [#tpu.dimension_semantics<parallel>, #tpu.dimension_semantics<arbitrary>], iteration_bounds = array<i64: 1, 2>, scalar_prefetch = 0 : i64, scratch_operands = 0 : i64, tpu.core_type = #tpu.core_type<tc>, window_params = [{transform_indices = @transform_0, window_bounds = array<i64: 16, 128>}, {pipeline_mode = #tpu.pipeline_mode<synchronous>, transform_indices = @transform_1, window_bounds = array<i64: 128, 512>}, {pipeline_mode = #tpu.pipeline_mode<synchronous>, transform_indices = @transform_2, window_bounds = array<i64: 1, 512>}, {pipeline_mode = #tpu.pipeline_mode<synchronous>, transform_indices = @transform_3, window_bounds = array<i64: 512, 128>}, {pipeline_mode = #tpu.pipeline_mode<synchronous>, transform_indices = @transform_4, window_bounds = array<i64: 1, 128>}, {transform_indices = @transform_5, window_bounds = array<i64: 16, 128>}]} {
    %c256_i32 = arith.constant 256 : i32
    %0 = arith.muli %arg1, %c256_i32 : i32
    %1 = tpu.assume_multiple %0, 128 : i32
    %c0 = arith.constant 0 : index
    %2 = arith.index_cast %1 : i32 to index
    %3 = vector.load %arg3[%c0, %2] : memref<128x512xf32, #tpu.memory_space<vmem>>, vector<128x256xf32>
    %c0_0 = arith.constant 0 : index
    %4 = arith.index_cast %1 : i32 to index
    %5 = vector.load %arg4[%c0_0, %4] : memref<1x512xf32, #tpu.memory_space<vmem>>, vector<1x256xf32>
    %6 = arith.index_cast %1 : i32 to index
    %c0_1 = arith.constant 0 : index
    %7 = vector.load %arg5[%6, %c0_1] : memref<512x128xf32, #tpu.memory_space<vmem>>, vector<256x128xf32>
    %c0_i32 = arith.constant 0 : i32
    %8 = arith.cmpi eq, %arg1, %c0_i32 : i32
    %9 = arith.extui %8 : i1 to i32
    %c0_i32_2 = arith.constant 0 : i32
    %10 = arith.cmpi ne, %9, %c0_i32_2 : i32
    scf.if %10 {
      %c0_11 = arith.constant 0 : index
      %c0_12 = arith.constant 0 : index
      %21 = vector.load %arg6[%c0_11, %c0_12] : memref<1x128xf32, #tpu.memory_space<vmem>>, vector<1x128xf32>
      %22 = vector.shape_cast %21 : vector<1x128xf32> to vector<1x128xf32>
      %23 = vector.broadcast %22 : vector<1x128xf32> to vector<16x128xf32>
      %c0_13 = arith.constant 0 : index
      %c0_14 = arith.constant 0 : index
      %24 = vector.load %arg7[%c0_13, %c0_14] : memref<16x128xf32, #tpu.memory_space<vmem>>, vector<16x128xf32>
      tpu.vector_store %arg7[%c0_13, %c0_14], %23 {strides = array<i32>} : memref<16x128xf32, #tpu.memory_space<vmem>>, vector<16x128xf32>,
    } else {
    }
    %c0_3 = arith.constant 0 : index
    %c0_4 = arith.constant 0 : index
    %11 = vector.load %arg2[%c0_3, %c0_4] : memref<16x128xf32, #tpu.memory_space<vmem>>, vector<16x128xf32>
    %cst = arith.constant dense<0.000000e+00> : vector<16x256xf32>
    %12 = tpu.matmul %11, %3, %cst {dimension_numbers = #tpu.dot_dimension_numbers<[1], [0], [0], [1], [0, 0, 1, 1], [], []>} : vector<16x128xf32>, vector<128x256xf32>, vector<16x256xf32> -> vector<16x256xf32>
    %13 = vector.broadcast %5 : vector<1x256xf32> to vector<16x256xf32>
    %14 = arith.addf %12, %13 : vector<16x256xf32>
    %cst_5 = arith.constant 0.000000e+00 : f32
    %15 = vector.broadcast %cst_5 : f32 to vector<16x256xf32>
    %16 = arith.maximumf %14, %15 : vector<16x256xf32>
    %c0_6 = arith.constant 0 : index
    %c0_7 = arith.constant 0 : index
    %17 = vector.load %arg7[%c0_6, %c0_7] : memref<16x128xf32, #tpu.memory_space<vmem>>, vector<16x128xf32>
    %cst_8 = arith.constant dense<0.000000e+00> : vector<16x128xf32>
    %18 = tpu.matmul %16, %7, %cst_8 {dimension_numbers = #tpu.dot_dimension_numbers<[1], [0], [0], [1], [0, 0, 1, 1], [], []>} : vector<16x256xf32>, vector<256x128xf32>, vector<16x128xf32> -> vector<16x128xf32>
    %19 = arith.addf %17, %18 : vector<16x128xf32>
    %c0_9 = arith.constant 0 : index
    %c0_10 = arith.constant 0 : index
    %20 = vector.load %arg7[%c0_9, %c0_10] : memref<16x128xf32, #tpu.memory_space<vmem>>, vector<16x128xf32>
    tpu.vector_store %arg7[%c0_9, %c0_10], %19 {strides = array<i32>} : memref<16x128xf32, #tpu.memory_space<vmem>>, vector<16x128xf32>,
    return
  }
  func.func @transform_0(%arg0: i32, %arg1: i32) -> (i32, i32) {
    %c0_i32 = arith.constant 0 : i32
    %c0_i32_0 = arith.constant 0 : i32
    return %arg0, %c0_i32 : i32, i32
  }
  func.func @transform_1(%arg0: i32, %arg1: i32) -> (i32, i32) {
    %c0_i32 = arith.constant 0 : i32
    %c0_i32_0 = arith.constant 0 : i32
    %c0_i32_1 = arith.constant 0 : i32
    return %c0_i32, %c0_i32_0 : i32, i32
  }
  func.func @transform_2(%arg0: i32, %arg1: i32) -> (i32, i32) {
    %c0_i32 = arith.constant 0 : i32
    %c0_i32_0 = arith.constant 0 : i32
    %c0_i32_1 = arith.constant 0 : i32
    return %c0_i32, %c0_i32_0 : i32, i32
  }
  func.func @transform_3(%arg0: i32, %arg1: i32) -> (i32, i32) {
    %c0_i32 = arith.constant 0 : i32
    %c0_i32_0 = arith.constant 0 : i32
    %c0_i32_1 = arith.constant 0 : i32
    return %c0_i32, %c0_i32_0 : i32, i32
  }
  func.func @transform_4(%arg0: i32, %arg1: i32) -> (i32, i32) {
    %c0_i32 = arith.constant 0 : i32
    %c0_i32_0 = arith.constant 0 : i32
    %c0_i32_1 = arith.constant 0 : i32
    return %c0_i32, %c0_i32_0 : i32, i32
  }
  func.func @transform_5(%arg0: i32, %arg1: i32) -> (i32, i32) {
    %c0_i32 = arith.constant 0 : i32
    %c0_i32_0 = arith.constant 0 : i32
    return %arg0, %c0_i32 : i32, i32
  }
}

module attributes {stable_mosaic.version = 11 : i64} {
  func.func @ffn_kernel(%arg0: i32, %arg1: i32, %arg2: memref<16x128xf32, #tpu.memory_space<vmem>>, %arg3: memref<128x512xf32, #tpu.memory_space<vmem>>, %arg4: memref<1x512xf32, #tpu.memory_space<vmem>>, %arg5: memref<512x128xf32, #tpu.memory_space<vmem>>, %arg6: memref<1x128xf32, #tpu.memory_space<vmem>>, %arg7: memref<16x128xf32, #tpu.memory_space<vmem>>) attributes {dimension_semantics = [#tpu.dimension_semantics<parallel>, #tpu.dimension_semantics<arbitrary>], iteration_bounds = array<i64: 1, 2>, scalar_prefetch = 0 : i64, scratch_operands = 0 : i64, tpu.core_type = #tpu.core_type<tc>, window_params = [{transform_indices = @transform_0, window_bounds = array<i64: 16, 128>}, {pipeline_mode = #tpu.pipeline_mode<synchronous>, transform_indices = @transform_1, window_bounds = array<i64: 128, 512>}, {pipeline_mode = #tpu.pipeline_mode<synchronous>, transform_indices = @transform_2, window_bounds = array<i64: 1, 512>}, {pipeline_mode = #tpu.pipeline_mode<synchronous>, transform_indices = @transform_3, window_bounds = array<i64: 512, 128>}, {pipeline_mode = #tpu.pipeline_mode<synchronous>, transform_indices = @transform_4, window_bounds = array<i64: 1, 128>}, {transform_indices = @transform_5, window_bounds = array<i64: 16, 128>}]} {
    %c256_i32 = arith.constant 256 : i32
    %0 = arith.muli %arg1, %c256_i32 : i32
    %1 = tpu.assume_multiple %0, 128 : i32
    %c0 = arith.constant 0 : index
    %2 = arith.index_cast %1 : i32 to index
    %3 = vector.load %arg3[%c0, %2] : memref<128x512xf32, #tpu.memory_space<vmem>>, vector<128x256xf32>
    %c0_0 = arith.constant 0 : index
    %4 = arith.index_cast %1 : i32 to index
    %5 = vector.load %arg4[%c0_0, %4] : memref<1x512xf32, #tpu.memory_space<vmem>>, vector<1x256xf32>
    %6 = arith.index_cast %1 : i32 to index
    %c0_1 = arith.constant 0 : index
    %7 = vector.load %arg5[%6, %c0_1] : memref<512x128xf32, #tpu.memory_space<vmem>>, vector<256x128xf32>
    %c0_i32 = arith.constant 0 : i32
    %8 = arith.cmpi eq, %arg1, %c0_i32 : i32
    %9 = arith.extui %8 : i1 to i32
    %c0_i32_2 = arith.constant 0 : i32
    %10 = arith.cmpi ne, %9, %c0_i32_2 : i32
    scf.if %10 {
      %c0_11 = arith.constant 0 : index
      %c0_12 = arith.constant 0 : index
      %21 = vector.load %arg6[%c0_11, %c0_12] : memref<1x128xf32, #tpu.memory_space<vmem>>, vector<1x128xf32>
      %22 = vector.shape_cast %21 : vector<1x128xf32> to vector<1x128xf32>
      %23 = vector.broadcast %22 : vector<1x128xf32> to vector<16x128xf32>
      %c0_13 = arith.constant 0 : index
      %c0_14 = arith.constant 0 : index
      %24 = vector.load %arg7[%c0_13, %c0_14] : memref<16x128xf32, #tpu.memory_space<vmem>>, vector<16x128xf32>
      tpu.vector_store %arg7[%c0_13, %c0_14], %23 {strides = array<i32>} : memref<16x128xf32, #tpu.memory_space<vmem>>, vector<16x128xf32>,
    } else {
    }
    %c0_3 = arith.constant 0 : index
    %c0_4 = arith.constant 0 : index
    %11 = vector.load %arg2[%c0_3, %c0_4] : memref<16x128xf32, #tpu.memory_space<vmem>>, vector<16x128xf32>
    %cst = arith.constant dense<0.000000e+00> : vector<16x256xf32>
    %12 = tpu.matmul %11, %3, %cst {dimension_numbers = #tpu.dot_dimension_numbers<[1], [0], [0], [1], [0, 0, 1, 1], [], []>} : vector<16x128xf32>, vector<128x256xf32>, vector<16x256xf32> -> vector<16x256xf32>
    %13 = vector.broadcast %5 : vector<1x256xf32> to vector<16x256xf32>
    %14 = arith.addf %12, %13 : vector<16x256xf32>
    %cst_5 = arith.constant 0.000000e+00 : f32
    %15 = vector.broadcast %cst_5 : f32 to vector<16x256xf32>
    %16 = arith.maximumf %14, %15 : vector<16x256xf32>
    %c0_6 = arith.constant 0 : index
    %c0_7 = arith.constant 0 : index
    %17 = vector.load %arg7[%c0_6, %c0_7] : memref<16x128xf32, #tpu.memory_space<vmem>>, vector<16x128xf32>
    %cst_8 = arith.constant dense<0.000000e+00> : vector<16x128xf32>
    %18 = tpu.matmul %16, %7, %cst_8 {dimension_numbers = #tpu.dot_dimension_numbers<[1], [0], [0], [1], [0, 0, 1, 1], [], []>} : vector<16x256xf32>, vector<256x128xf32>, vector<16x128xf32> -> vector<16x128xf32>
    %19 = arith.addf %17, %18 : vector<16x128xf32>
    %c0_9 = arith.constant 0 : index
    %c0_10 = arith.constant 0 : index
    %20 = vector.load %arg7[%c0_9, %c0_10] : memref<16x128xf32, #tpu.memory_space<vmem>>, vector<16x128xf32>
    tpu.vector_store %arg7[%c0_9, %c0_10], %19 {strides = array<i32>} : memref<16x128xf32, #tpu.memory_space<vmem>>, vector<16x128xf32>,
    return
  }
  func.func @transform_0(%arg0: i32, %arg1: i32) -> (i32, i32) {
    %c0_i32 = arith.constant 0 : i32
    %c0_i32_0 = arith.constant 0 : i32
    return %arg0, %c0_i32 : i32, i32
  }
  func.func @transform_1(%arg0: i32, %arg1: i32) -> (i32, i32) {
    %c0_i32 = arith.constant 0 : i32
    %c0_i32_0 = arith.constant 0 : i32
    %c0_i32_1 = arith.constant 0 : i32
    return %c0_i32, %c0_i32_0 : i32, i32
  }
  func.func @transform_2(%arg0: i32, %arg1: i32) -> (i32, i32) {
    %c0_i32 = arith.constant 0 : i32
    %c0_i32_0 = arith.constant 0 : i32
    %c0_i32_1 = arith.constant 0 : i32
    return %c0_i32, %c0_i32_0 : i32, i32
  }
  func.func @transform_3(%arg0: i32, %arg1: i32) -> (i32, i32) {
    %c0_i32 = arith.constant 0 : i32
    %c0_i32_0 = arith.constant 0 : i32
    %c0_i32_1 = arith.constant 0 : i32
    return %c0_i32, %c0_i32_0 : i32, i32
  }
  func.func @transform_4(%arg0: i32, %arg1: i32) -> (i32, i32) {
    %c0_i32 = arith.constant 0 : i32
    %c0_i32_0 = arith.constant 0 : i32
    %c0_i32_1 = arith.constant 0 : i32
    return %c0_i32, %c0_i32_0 : i32, i32
  }
  func.func @transform_5(%arg0: i32, %arg1: i32) -> (i32, i32) {
    %c0_i32 = arith.constant 0 : i32
    %c0_i32_0 = arith.constant 0 : i32
    return %arg0, %c0_i32 : i32, i32
  }
}

</mosaic_0001>

<bundles_post_ra>
// kernel: tpu_custom_call.1
= control target key start
LH: loop header
LB: loop body
LE: loop exit
PB: predicated region body
PF: predicated region fallthrough
CT: control target
= control target key end

     0   :  { %10 = vsyncpa [#allocation3], 0  ;;  %s1382_s0 = inlined_call_operand.hbm [shape: f32[16,128], index: 0, kind: input, shape index: {}]   ;;  %s1383_s1 = inlined_call_operand.hbm [shape: f32[128,512], index: 1, kind: input, shape index: {}]   ;;  %s1384_s2 = inlined_call_operand.vmem [shape: f32[1,512], index: 2, kind: input, shape index: {}]   ;;  %s1385_s3 = inlined_call_operand.hbm [shape: f32[512,128], index: 3, kind: input, shape index: {}]   ;;  %s1386_s4 = inlined_call_operand.vmem [shape: f32[1,128], index: 4, kind: input, shape index: {}]   ;;  %s1387_s5 = inlined_call_operand.hbm [shape: f32[16,128], index: 5, kind: output, shape index: {}]  }
   0x1   :  { %11 = vsyncpa [#allocation6], 0 }
   0x2   :  { %12 = vsyncpa [#allocation4], 0  ;;  %s985_s18 = smov 0   ;;  %s987_s19 = smov 0  }
   0x3   :  { %s989_s20 = smov 0  }
   0x4 LB: > { %s944_s21 = smov [#allocation5]   ;;  %s610_s23 = sadd.s32 4294967295, %s942_s20   ;;  %s942_s20 = sphi %s989_s20, %s18_s20   ;;  %s938_s19 = sphi %s987_s19, %s1421_s19   ;;  %s934_s18 = sphi %s985_s18, %s1420_s18  }
   0x5   : > { %s199_s22 = sshll.u32 %s944_s21, 4  ;;  %p611_p0 = scmp.ge.s32.totalorder %s942_s20, 1  ;;  %s1009_s22 = int_to_ptr.vmem [resolvable:$true] %s199_s22 }
   0x6   : > { %p171_p1 = scmp.lt.s32.totalorder %s942_s20, 3  ;;  %p1005_p2 = scmp.eq.s32.totalorder %s610_s23, 0 }
   0x7   : > { %s27_s27 = sadd.s32 1, %s938_s19  ;;  %s945_s29 = smov [#allocation2]  }
   0x8   : > { %s1392_s24 = scalar_select %p1005_p2, 1, 0 }
   0x9   : > { %p1011_p3 = pnand %p611_p0, %p171_p1  ;;  %p1024_p6 = scmp.ge.s32.totalorder %s27_s27, 2 }
   0xa   : > { %s186_s30 = sshll.u32 %s945_s29, 4  ;;  %s798_s8 = scalar_lea.hbm %s1383_s1, 8192  ;;  %s187_s30 = int_to_ptr.vmem [resolvable:$true] %s186_s30 }
   0xb   : > { %s1393_s25 = scalar_select %p1011_p3, 1, 0 }
   0xc   : > { %p745_p4 = pneg %p1011_p3  ;;  %p799_p7 = scmp.ne.s32.totalorder %s1383_s1, %s798_s8 }
   0xd   : > { %p805_p11 = scmp.lt.u32.totalorder %s798_s8, %s1383_s1 }
   0xe   : > { %p1019_p5 = pnand %p1005_p2, %p745_p4 }
  0x10   : > { %p1036_p8 = pneg %p1019_p5 }
  0x12   : > { %p801_p9 = pnand %p1036_p8, %p799_p7 }
  0x14   : > { %p802_p10 = pneg %p801_p9 }
  0x16   : > { %p807_p12 = pnand %p805_p11, %p802_p10 }
  0x18   : > { %810 = shalt.err (!%p807_p12)
}
  0x19   : > { %s811_s14 = scalar_lea.vmem %s1009_s22, 8192  ;;  %p819_p4 = scmp.lt.s32.totalorder %s1009_s22, %s1009_s22 }
  0x1a   : > { %p812_p13 = scmp.ne.s32.totalorder %s1009_s22, %s811_s14  ;;  %p820_p2 = scmp.lt.s32.totalorder %s811_s14, %s811_s14 }
  0x1c   : > { %p814_p0 = pnand %p812_p13, %p1036_p8  ;;  %p821_p7 = por %p820_p2, %p819_p4 }
  0x1e   : > { %p815_p1 = pneg %p814_p0 }
  0x20   : > { %p822_p9 = pnand %p821_p7, %p815_p1 }
  0x22   : > { %825 = shalt.err (!%p822_p9)
}
  0x23   : > { %s946_s15 = smov 512   ;;  %s947_s16 = smov 32  }
  0x24   : > { %751 = dma.hbm_to_vmem [thread:$0]  (!%p1019_p5), %s1383_s1, 8192, %s1009_s22, [#allocation6], %s946_s15, %s946_s15, %s947_s16  }
  0x25   : > { %s1423_s27 = smov (%p1024_p6, %s27_s27), 0  ;;  %s826_s7 = scalar_lea.hbm %s1382_s0, 256 }
  0x26   : > { %p827_p2 = scmp.ne.s32.totalorder %s1382_s0, %s826_s7  ;;  %p833_p12 = scmp.lt.u32.totalorder %s826_s7, %s1382_s0 }
  0x28   : > { %p829_p10 = pnand %p827_p2, %p1036_p8 }
  0x2a   : > { %p830_p11 = pneg %p829_p10 }
  0x2c   : > { %p835_p13 = pnand %p833_p12, %p830_p11 }
  0x2e   : > { %838 = shalt.err (!%p835_p13)
}
  0x2f   : > { %s839_s22 = scalar_lea.vmem %s187_s30, 256  ;;  %p847_p4 = scmp.lt.s32.totalorder %s187_s30, %s187_s30 }
  0x30   : > { %p840_p6 = scmp.ne.s32.totalorder %s187_s30, %s839_s22  ;;  %p848_p7 = scmp.lt.s32.totalorder %s839_s22, %s839_s22 }
  0x32   : > { %p842_p0 = pnand %p840_p6, %p1036_p8  ;;  %p849_p9 = por %p848_p7, %p847_p4 }
  0x34   : > { %p843_p1 = pneg %p842_p0 }
  0x36   : > { %p850_p3 = pnand %p849_p9, %p843_p1 }
  0x38   : > { %853 = shalt.err (!%p850_p3)
}
  0x39   : > { %s948_s28 = smov 128   ;;  %s949_s13 = smov 8  }
  0x3a   : > { %748 = dma.hbm_to_vmem [thread:$0]  (!%p1019_p5), %s1382_s0, 256, %s187_s30, [#allocation3], %s948_s28, %s948_s28, %s949_s13  }
  0x3b   : > { %s950_s16 = smov [#allocation7]   ;;  %s854_s6 = scalar_lea.hbm %s1385_s3, 8192 }
  0x3c   : > { %s215_s17 = sshll.u32 %s950_s16, 4  ;;  %p855_p3 = scmp.ne.s32.totalorder %s1385_s3, %s854_s6  ;;  %s216_s17 = int_to_ptr.vmem [resolvable:$true] %s215_s17 }
  0x3d   : > { %p861_p11 = scmp.lt.u32.totalorder %s854_s6, %s1385_s3 }
  0x3e   : > { %p857_p2 = pnand %p855_p3, %p1036_p8 }
  0x40   : > { %p858_p10 = pneg %p857_p2 }
  0x42   : > { %p863_p12 = pnand %p861_p11, %p858_p10 }
  0x44   : > { %866 = shalt.err (!%p863_p12)
}
  0x45   : > { %s867_s30 = scalar_lea.vmem %s216_s17, 8192  ;;  %p875_p1 = scmp.lt.s32.totalorder %s216_s17, %s216_s17 }
  0x46   : > { %p868_p13 = scmp.ne.s32.totalorder %s216_s17, %s867_s30  ;;  %p876_p4 = scmp.lt.s32.totalorder %s867_s30, %s867_s30 }
  0x48   : > { %p870_p6 = pnand %p868_p13, %p1036_p8  ;;  %p877_p7 = por %p876_p4, %p875_p1 }
  0x4a   : > { %p871_p0 = pneg %p870_p6 }
  0x4c   : > { %p878_p9 = pnand %p877_p7, %p871_p0 }
  0x4e   : > { %881 = shalt.err (!%p878_p9)
}
  0x4f   : > { %754 = dma.hbm_to_vmem [thread:$0]  (!%p1019_p5), %s1385_s3, 8192, %s216_s17, [#allocation6], %s948_s28, %s948_s28, %s949_s13  }
  0x50   : > { %p1397_p3 = scmp.ne.s32.totalorder %s1393_s25, 0 }
  0x52   : > { %234 = sbr.rel (%p1397_p3) target bundleno = 612 (0x264), region = 40 }
  0x59   : > { %p1398_p2 = scmp.ne.s32.totalorder %s1392_s24, 0 }
  0x5b   : > { %921 = dma.done.wait (%p1398_p2), [#allocation3], 256  }
  0x5c   : > { %923 = vsyncadd (%p1398_p2), [#allocation3], 4294967040 }
  0x5d   : > { %925 = dma.done.wait (%p1398_p2), [#allocation6], 16384  }
  0x5e   : > { %927 = vsyncadd (%p1398_p2), [#allocation6], 4294950912  ;;  %s619_s26 = sshll.u32 %s934_s18, 8  ;;  %p621_p5 = scmp.ne.s32.totalorder %s934_s18, 0 }
  0x5f   : > { %s1110_s11 = sshra.s32 %s619_s26, 7  ;;  %s1219_s15 = scalar_lea.vmem [#allocation7], %s619_s26 }
  0x60   : > { %s620_s25 = sshll.u32 %s1110_s11, 3  ;;  %s299_s14 = scalar_lea.vmem %s1384_s2, %s1110_s11  ;;  %v302_v33 = vld [vmem:[%s1219_s15] sm:$0xff]  ;;  %v303_v34 = vld [vmem:[%s1219_s15 + $0x8] sm:$0xff]  ;;  %v304_v35 = vld [vmem:[%s1219_s15 + $0x10] sm:$0xff] }
  0x61   : > { %s1113_s28 = scalar_lea.vmem [#allocation5], %s620_s25  ;;  %v1215_v32 = vld [vmem:[%s299_s14] sm:$0x3]  ;;  %v305_v36 = vld [vmem:[%s1219_s15 + $0x18] sm:$0xff]  ;;  %v1229_v38 = vld [vmem:[%s1219_s15 + $0x28] sm:$0xff] }
  0x62   : > { %v1116_v0 = vld [vmem:[%s1113_s28] sm:$0xff]  ;;  %v1119_v1 = vld [vmem:[%s1113_s28 + $0x8] sm:$0xff]  ;;  %1401 = vst [vmem:[#allocation14_spill] sm:$0xff] %v1215_v32  ;;  %v1232_v39 = vld [vmem:[%s1219_s15 + $0x30] sm:$0xff] }
  0x63   : > { %v1122_v2 = vld [vmem:[%s1113_s28 + $0x20] sm:$0xff]  ;;  %v1125_v3 = vld [vmem:[%s1113_s28 + $0x28] sm:$0xff]  ;;  %v1235_v40 = vld [vmem:[%s1219_s15 + $0x38] sm:$0xff] }
  0x64   : > { %v1128_v4 = vld [vmem:[%s1113_s28 + $0x40] sm:$0xff]  ;;  %v1131_v5 = vld [vmem:[%s1113_s28 + $0x48] sm:$0xff]  ;;  %v1244_v43 = vld [vmem:[%s1219_s15 + $0x50] sm:$0xff] }
  0x65   : > { %v1134_v6 = vld [vmem:[%s1113_s28 + $0x60] sm:$0xff]  ;;  %v1137_v7 = vld [vmem:[%s1113_s28 + $0x68] sm:$0xff]  ;;  %v1247_v44 = vld [vmem:[%s1219_s15 + $0x58] sm:$0xff] }
  0x66   : > { %v1140_v8 = vld [vmem:[%s1113_s28 + $0x80] sm:$0xff]  ;;  %v1143_v9 = vld [vmem:[%s1113_s28 + $0x88] sm:$0xff]  ;;  %v1256_v47 = vld [vmem:[%s1219_s15 + $0x70] sm:$0xff] }
  0x67   : > { %v1146_v10 = vld [vmem:[%s1113_s28 + $0xa0] sm:$0xff]  ;;  %v1149_v11 = vld [vmem:[%s1113_s28 + $0xa8] sm:$0xff]  ;;  %1404 = vst [vmem:[#allocation17_spill] sm:$0xff] %v1256_v47  ;;  %v1259_v48 = vld [vmem:[%s1219_s15 + $0x78] sm:$0xff] }
  0x68   : > { %v1152_v12 = vld [vmem:[%s1113_s28 + $0xc0] sm:$0xff]  ;;  %v1155_v13 = vld [vmem:[%s1113_s28 + $0xc8] sm:$0xff]  ;;  %1405 = vst [vmem:[#allocation18_spill] sm:$0xff] %v1259_v48  ;;  %v320_v51 = vld [vmem:[%s1219_s15 + $0x90] sm:$0xff] }
  0x69   : > { %v1158_v14 = vld [vmem:[%s1113_s28 + $0xe0] sm:$0xff]  ;;  %v1161_v15 = vld [vmem:[%s1113_s28 + $0xe8] sm:$0xff]  ;;  %v321_v52 = vld [vmem:[%s1219_s15 + $0x98] sm:$0xff] }
  0x6a   : > { %v1164_v16 = vld [vmem:[%s1113_s28 + $0x100] sm:$0xff]  ;;  %v1167_v17 = vld [vmem:[%s1113_s28 + $0x108] sm:$0xff]  ;;  %v324_v55 = vld [vmem:[%s1219_s15 + $0xb0] sm:$0xff] }
  0x6b   : > { %v1170_v18 = vld [vmem:[%s1113_s28 + $0x120] sm:$0xff]  ;;  %v1173_v19 = vld [vmem:[%s1113_s28 + $0x128] sm:$0xff]  ;;  %v325_v56 = vld [vmem:[%s1219_s15 + $0xb8] sm:$0xff] }
  0x6c   : > { %v1176_v20 = vld [vmem:[%s1113_s28 + $0x140] sm:$0xff]  ;;  %v1179_v21 = vld [vmem:[%s1113_s28 + $0x148] sm:$0xff]  ;;  %v1272_v59 = vld [vmem:[%s1219_s15 + $0xd0] sm:$0xff] }
  0x6d   : > { %v1182_v22 = vld [vmem:[%s1113_s28 + $0x160] sm:$0xff]  ;;  %v1185_v23 = vld [vmem:[%s1113_s28 + $0x168] sm:$0xff]  ;;  %v1275_v60 = vld [vmem:[%s1219_s15 + $0xd8] sm:$0xff] }
  0x6e   : > { %v1192_v24 = vld [vmem:[%s1113_s28 + $0x180] sm:$0xff]  ;;  %v1195_v25 = vld [vmem:[%s1113_s28 + $0x188] sm:$0xff]  ;;  %v1284_v63 = vld [vmem:[%s1219_s15 + $0xf0] sm:$0xff] }
  0x6f   : > { %v1198_v26 = vld [vmem:[%s1113_s28 + $0x1a0] sm:$0xff]  ;;  %v1201_v27 = vld [vmem:[%s1113_s28 + $0x1a8] sm:$0xff]  ;;  %1407 = vst [vmem:[#allocation20_spill] sm:$0xff] %v1284_v63  ;;  %v1287_v32 = vld [vmem:[%s1219_s15 + $0xf8] sm:$0xff] }
  0x70   : > { %v1204_v28 = vld [vmem:[%s1113_s28 + $0x1c0] sm:$0xff]  ;;  %v1207_v29 = vld [vmem:[%s1113_s28 + $0x1c8] sm:$0xff]  ;;  %1408 = vst [vmem:[#allocation21_spill] sm:$0xff] %v1287_v32 }
  0x71   : > { %1399 = vst [vmem:[#allocation12_spill] sm:$0xff] %v1204_v28  ;;  %v1210_v30 = vld [vmem:[%s1113_s28 + $0x1e0] sm:$0xff]  ;;  %v1213_v31 = vld [vmem:[%s1113_s28 + $0x1e8] sm:$0xff] }
  0x72   : > { %1400 = vst [vmem:[#allocation13_spill] sm:$0xff] %v1210_v30  ;;  %v1226_v37 = vld [vmem:[%s1219_s15 + $0x20] sm:$0xff]  ;;  %v1241_v42 = vld [vmem:[%s1219_s15 + $0x48] sm:$0xff]  ;;  %337 = sbr.rel (%p621_p5) target bundleno = 123 (0x7b), region = 56 }
  0x73   : > { %v1238_v41 = vld [vmem:[%s1219_s15 + $0x40] sm:$0xff]  ;;  %v1253_v46 = vld [vmem:[%s1219_s15 + $0x68] sm:$0xff] }
  0x74   : > { %v1250_v45 = vld [vmem:[%s1219_s15 + $0x60] sm:$0xff]  ;;  %1403 = vst [vmem:[#allocation16_spill] sm:$0xff] %v1253_v46  ;;  %v319_v50 = vld [vmem:[%s1219_s15 + $0x88] sm:$0xff] }
  0x75   : > { %1402 = vst [vmem:[#allocation15_spill] sm:$0xff] %v1250_v45  ;;  %v318_v49 = vld [vmem:[%s1219_s15 + $0x80] sm:$0xff]  ;;  %v323_v54 = vld [vmem:[%s1219_s15 + $0xa8] sm:$0xff] }
  0x76   : > { %v322_v53 = vld [vmem:[%s1219_s15 + $0xa0] sm:$0xff]  ;;  %v327_v58 = vld [vmem:[%s1219_s15 + $0xc8] sm:$0xff] }
  0x77   : > { %v326_v57 = vld [vmem:[%s1219_s15 + $0xc0] sm:$0xff]  ;;  %v1281_v62 = vld [vmem:[%s1219_s15 + $0xe8] sm:$0xff] }
  0x78   : > { %v1278_v61 = vld [vmem:[%s1219_s15 + $0xe0] sm:$0xff]  ;;  %1406 = vst [vmem:[#allocation19_spill] sm:$0xff] %v1281_v62 }
  0x79   : > { %v622_v48 = vld [vmem:[%s1386_s4] ss:$0 sm:$0xff] }
  0x7a   : > { %345 = vst [vmem:[#allocation8] sm:$0xff] %v622_v48  ;;  %346 = vst [vmem:[#allocation8 + $0x8] sm:$0xff] %v622_v48 }
  0x7b PF: > { %v665_v47 = vpack.c.bf16 %v1125_v3, %v1119_v1  ;;  %v667_v46 = vpack.c.bf16 %v1122_v2, %v1116_v0  ;;  %v669_v63 = vpack.c.bf16 %v1137_v7, %v1131_v5  ;;  %v671_v32 = vpack.c.bf16 %v1134_v6, %v1128_v4  ;;  %s952_s18 = smov [#allocation8]   ;;  %p1347_p8 = scmp.eq.s32.totalorder %s610_s23, 1 }
  0x7c   : > { %v673_v45 = vpack.c.bf16 %v1149_v11, %v1143_v9  ;;  %v697_v48 = vpack.c.bf16 %v319_v50, %v318_v49  ;;  %v699_v30 = vpack.c.bf16 %v303_v34, %v302_v33  ;;  %v701_v28 = vpack.c.bf16 %v321_v52, %v320_v51  ;;  %v1417_v33 = vld [vmem:[#allocation18_spill] sm:$0xff]  ;;  %s531_s21 = sshll.u32 %s952_s18, 4  ;;  %s532_s21 = int_to_ptr.vmem [resolvable:$true] %s531_s21 }
  0x7d   : > { %666 = vmatprep.subr.bf16.mxu0 %v665_v47  ;;  %v951_v62 = vmov 0.0   ;;  %v675_v0 = vpack.c.bf16 %v1146_v10, %v1140_v8  ;;  %v703_v1 = vpack.c.bf16 %v305_v36, %v304_v35  ;;  %v677_v2 = vpack.c.bf16 %v1161_v15, %v1155_v13  ;;  %s882_s6 = scalar_lea.vmem %s532_s21, 256  ;;  %p889_p13 = scmp.lt.s32.totalorder %s532_s21, %s532_s21 }
  0x7e   : > { %668 = vmatpush1.bf16.msra.mxu0 %v667_v46  ;;  %424 = vmatprep.mubr.f32.mxu0 %v951_v62  ;;  %v705_v3 = vpack.c.bf16 %v323_v54, %v322_v53  ;;  %v679_v4 = vpack.c.bf16 %v1158_v14, %v1152_v12  ;;  %v707_v5 = vpack.c.bf16 %v1229_v38, %v1226_v37  ;;  %v350_v35 = vlaneseq  ;;  %p883_p10 = scmp.ne.s32.totalorder %s532_s21, %s882_s6  ;;  %p890_p6 = scmp.lt.s32.totalorder %s882_s6, %s882_s6 }
  0x7f   : > { %670 = vmatprep.subr.bf16.mxu0 %v669_v63  ;;  %698 = vmatprep.subr.bf16.mxu1 %v697_v48  ;;  %v681_v6 = vpack.c.bf16 %v1173_v19, %v1167_v17  ;;  %v709_v7 = vpack.c.bf16 %v325_v56, %v324_v55  ;;  %v683_v8 = vpack.c.bf16 %v1170_v18, %v1164_v16 }
  0x80   : > { %700 = vmatpush3.bf16.msra.mxu1 %v699_v30  ;;  %v711_v9 = vpack.c.bf16 %v1235_v40, %v1232_v39  ;;  %v685_v10 = vpack.c.bf16 %v1185_v23, %v1179_v21  ;;  %v713_v11 = vpack.c.bf16 %v327_v58, %v326_v57  ;;  %v687_v12 = vpack.c.bf16 %v1182_v22, %v1176_v20  ;;  %v1410_v21 = vld [vmem:[#allocation12_spill] sm:$0xff]  ;;  %v1411_v22 = vld [vmem:[#allocation13_spill] sm:$0xff]  ;;  %v1418_v39 = vld [vmem:[#allocation14_spill] sm:$0xff]  ;;  %p884_p11 = pnand %p883_p10, %p1347_p8  ;;  %p891_p0 = por %p890_p6, %p889_p13 }
  0x81   : > { %702 = vmatprep.subr.bf16.mxu1 %v701_v28  ;;  %v715_v13 = vpack.c.bf16 %v1241_v42, %v1238_v41  ;;  %v689_v14 = vpack.c.bf16 %v1201_v27, %v1195_v25  ;;  %v717_v15 = vpack.c.bf16 %v1275_v60, %v1272_v59  ;;  %v691_v16 = vpack.c.bf16 %v1198_v26, %v1192_v24  ;;  %v1409_v19 = vld [vmem:[#allocation19_spill] sm:$0xff]  ;;  %v347_v24 = vld [vmem:[#allocation2] sm:$0xff]  ;;  %v348_v25 = vld [vmem:[#allocation2 + $0x8] sm:$0xff] }
  0x82   : > { %672 = vmatpush1.bf16.msra.mxu0 %v671_v32  ;;  %v719_v17 = vpack.c.bf16 %v1247_v44, %v1244_v43  ;;  %v693_v18 = vpack.c.bf16 %v1213_v31, %v1207_v29  ;;  %v721_v20 = vpack.c.bf16 %v1409_v19, %v1278_v61  ;;  %v695_v23 = vpack.c.bf16 %v1411_v22, %v1410_v21  ;;  %v1412_v26 = vld [vmem:[#allocation15_spill] sm:$0xff]  ;;  %v1413_v27 = vld [vmem:[#allocation16_spill] sm:$0xff]  ;;  %v1415_v30 = vld [vmem:[#allocation21_spill] sm:$0xff]  ;;  %p885_p12 = pneg %p884_p11 }
  0x83   : > { %674 = vmatprep.subr.bf16.mxu0 %v673_v45  ;;  %v723_v28 = vpack.c.bf16 %v1413_v27, %v1412_v26  ;;  %v1414_v29 = vld [vmem:[#allocation20_spill] sm:$0xff]  ;;  %v1416_v32 = vld [vmem:[#allocation17_spill] sm:$0xff]  ;;  %v351_v36 = vshrl.u32 %v350_v35, 7  ;;  %v441_v56 = vld [vmem:[#allocation8] sm:$0xff] }
  0x84   : > { %704 = vmatpush3.bf16.msra.mxu1 %v703_v1  ;;  %v725_v31 = vpack.c.bf16 %v1415_v30, %v1414_v29  ;;  %v727_v34 = vpack.c.bf16 %v1417_v33, %v1416_v32  ;;  %v442_v61 = vld [vmem:[#allocation8 + $0x8] sm:$0xff]  ;;  %p892_p1 = pnand %p891_p0, %p885_p12 }
  0x85   : > { %706 = vmatprep.subr.bf16.mxu1 %v705_v3  ;;  %v352_v37 = vsub.s32 0, %v351_v36  ;;  %v356_v38 = vsub.s32 1, %v351_v36 }
  0x86   : > { %676 = vmatpush1.bf16.msra.mxu0 %v675_v0 }
  0x87   : > { %678 = vmatprep.subr.bf16.mxu0 %v677_v2  ;;  %v353_v40 = vrot.slane %v1418_v39, %v352_v37  ;;  %v357_v41 = vrot.slane %v1418_v39, %v356_v38 }
  0x88   : > { %708 = vmatpush3.bf16.msra.mxu1 %v707_v5 }
  0x89   : > { %710 = vmatprep.subr.bf16.mxu1 %v709_v7 }
  0x8a   : > { %680 = vmatpush1.bf16.msra.mxu0 %v679_v4 }
  0x8b   : > { %682 = vmatprep.subr.bf16.mxu0 %v681_v6 }
  0x8c   : > { %712 = vmatpush3.bf16.msra.mxu1 %v711_v9 }
  0x8d   : > { %714 = vmatprep.subr.bf16.mxu1 %v713_v11 }
  0x8e   : > { %684 = vmatpush1.bf16.msra.mxu0 %v683_v8 }
  0x8f   : > { %686 = vmatprep.subr.bf16.mxu0 %v685_v10 }
  0x90   : > { %716 = vmatpush3.bf16.msra.mxu1 %v715_v13 }
  0x91   : > { %718 = vmatprep.subr.bf16.mxu1 %v717_v15 }
  0x92   : > { %688 = vmatpush1.bf16.msra.mxu0 %v687_v12 }
  0x93   : > { %690 = vmatprep.subr.bf16.mxu0 %v689_v14 }
  0x94   : > { %720 = vmatpush3.bf16.msra.mxu1 %v719_v17 }
  0x95   : > { %722 = vmatprep.subr.bf16.mxu1 %v721_v20 }
  0x96   : > { %692 = vmatpush1.bf16.msra.mxu0 %v691_v16 }
  0x97   : > { %694 = vmatprep.subr.bf16.mxu0 %v693_v18 }
  0x98   : > { %724 = vmatpush3.bf16.msra.mxu1 %v723_v28 }
  0x99   : > { %726 = vmatprep.subr.bf16.mxu1 %v725_v31 }
  0x9a   : > { %696 = vmatpush1.bf16.msra.mxu0 %v695_v23 }
  0x9c   : > { %728 = vmatpush3.bf16.msra.mxu1 %v727_v34 }
  0x9d   : > { %425 = vmatmul.mubr.f32.vlgmr.msra.gmra.mrb[0].mxu0 %v347_v24 }
  0x9e   : > { %430 = vmatprep.mubr.f32.mxu0 %v951_v62 }
  0xa1   : > { %431 = vmatmul.mubr.f32.gmra.mrb[2].mxu0 %v348_v25 }
 0x170   : > { %v426_v42 = vpop.f32.mrb[0].mxu0 }
 0x171   : > { %v427_v43 = vadd.f32 %v426_v42, %v353_v40  ;;  %v428_v44 = vpop.f32.mrb[1].mxu0 }
 0x172   : > { %v429_v45 = vadd.f32 %v428_v44, %v357_v41 }
 0x173   : > { %v437_v49 = vmax.f32 %v427_v43, 0.0 }
 0x174   : > { %v432_v46 = vpop.f32.mrb[2].mxu0  ;;  %v438_v47 = vmax.f32 %v429_v45, 0.0 }
 0x175   : > { %v433_v50 = vadd.f32 %v432_v46, %v353_v40  ;;  %v434_v51 = vpop.f32.mrb[3].mxu0 }
 0x176   : > { %v435_v52 = vadd.f32 %v434_v51, %v357_v41  ;;  %507 = vmatprep.mubr.f32.mxu1 %v438_v47 }
 0x177   : > { %508 = vmatmul.mubr.f32.vlgmr.msra.gmra.mrb[0].mxu1 %v437_v49  ;;  %v439_v54 = vmax.f32 %v433_v50, 0.0 }
 0x178   : > { %v440_v53 = vmax.f32 %v435_v52, 0.0 }
 0x17a   : > { %512 = vmatprep.mubr.f32.mxu1 %v440_v53 }
 0x17b   : > { %513 = vmatmul.mubr.f32.gmra.mrb[2].mxu1 %v439_v54 }
 0x24a   : > { %v659_v55 = vpop.f32.mrb[0].mxu1 }
 0x24b   : > { %v660_v57 = vpop.f32.mrb[1].mxu1 }
 0x24c   : > { %v661_v58 = vadd.f32 %v660_v57, %v659_v55 }
 0x24e   : > { %v518_v59 = vadd.f32 %v661_v58, %v441_v56  ;;  %v662_v60 = vpop.f32.mrb[2].mxu1 }
 0x24f   : > { %v663_v62 = vpop.f32.mrb[3].mxu1 }
 0x250   : > { %520 = vst [vmem:[#allocation8] sm:$0xff] %v518_v59  ;;  %v664_v63 = vadd.f32 %v663_v62, %v662_v60 }
 0x252   : > { %v519_v48 = vadd.f32 %v664_v63, %v442_v61 }
 0x254   : > { %521 = vst [vmem:[#allocation8 + $0x8] sm:$0xff] %v519_v48 }
 0x255   : > { %895 = shalt.err (!%p892_p1)
}
 0x256   : > { %s896_s23 = scalar_lea.hbm %s1387_s5, 256 }
 0x257   : > { %p897_p4 = scmp.ne.s32.totalorder %s1387_s5, %s896_s23  ;;  %p902_p3 = scmp.lt.u32.totalorder %s896_s23, %s1387_s5 }
 0x259   : > { %p898_p7 = pnand %p897_p4, %p1347_p8 }
 0x25b   : > { %p899_p9 = pneg %p898_p7 }
 0x25d   : > { %p904_p2 = pnand %p902_p3, %p899_p9 }
 0x25f   : > { %907 = shalt.err (!%p904_p2)
}
 0x260   : > { %s953_s22 = smov 128   ;;  %s954_s26 = smov 8  }
 0x261   : > { %742 = dma.vmem_to_hbm [thread:$0]  (%p1347_p8), %s532_s21, 256, %s1387_s5, [#allocation4], %s953_s22, %s953_s22, %s954_s26  }
 0x262   : > { %929 = dma.done.wait (%p1347_p8), [#allocation4], 256  }
 0x263   : > { %931 = vsyncadd (%p1347_p8), [#allocation4], 4294967040 }
 0x264 PF: > { %s18_s20 = sadd.s32 1, %s942_s20   ;;  %s1420_s18 = smov %s938_s19 }
 0x265   : > { %p15_p5 = scmp.ge.s32.totalorder %s18_s20, 4   ;;  %s1421_s19 = smov %s1423_s27 }
 0x267   :  { %17 = sbr.rel (!%p15_p5) target bundleno = 4 (0x4), region = 86 }
 0x26e   :  { %547 = vsyncpa [#allocation3], 1 }
 0x26f   :  { %549 = vsyncpa [#allocation3 + $0x1], 1 }
 0x270   :  { %550 = vsyncpa [#allocation6], 1 }
 0x271   :  { %551 = vsyncpa [#allocation4], 1 }
 0x272   :  { %553 = vsyncpa [#allocation4 + $0x1], 1 }

// kernel: tpu_custom_call.1
= control target key start
LH: loop header
LB: loop body
LE: loop exit
PB: predicated region body
PF: predicated region fallthrough
CT: control target
= control target key end

     0   :  { %10 = vsyncpa [#allocation3], 0  ;;  %s1382_s0 = inlined_call_operand.hbm [shape: f32[16,128], index: 0, kind: input, shape index: {}]   ;;  %s1383_s1 = inlined_call_operand.hbm [shape: f32[128,512], index: 1, kind: input, shape index: {}]   ;;  %s1384_s2 = inlined_call_operand.vmem [shape: f32[1,512], index: 2, kind: input, shape index: {}]   ;;  %s1385_s3 = inlined_call_operand.hbm [shape: f32[512,128], index: 3, kind: input, shape index: {}]   ;;  %s1386_s4 = inlined_call_operand.vmem [shape: f32[1,128], index: 4, kind: input, shape index: {}]   ;;  %s1387_s5 = inlined_call_operand.hbm [shape: f32[16,128], index: 5, kind: output, shape index: {}]  }
   0x1   :  { %11 = vsyncpa [#allocation6], 0 }
   0x2   :  { %12 = vsyncpa [#allocation4], 0  ;;  %s985_s18 = smov 0   ;;  %s987_s19 = smov 0  }
   0x3   :  { %s989_s20 = smov 0  }
   0x4 LB: > { %s944_s21 = smov [#allocation5]   ;;  %s610_s23 = sadd.s32 4294967295, %s942_s20   ;;  %s942_s20 = sphi %s989_s20, %s18_s20   ;;  %s938_s19 = sphi %s987_s19, %s1421_s19   ;;  %s934_s18 = sphi %s985_s18, %s1420_s18  }
   0x5   : > { %s199_s22 = sshll.u32 %s944_s21, 4  ;;  %p611_p0 = scmp.ge.s32.totalorder %s942_s20, 1  ;;  %s1009_s22 = int_to_ptr.vmem [resolvable:$true] %s199_s22 }
   0x6   : > { %p171_p1 = scmp.lt.s32.totalorder %s942_s20, 3  ;;  %p1005_p2 = scmp.eq.s32.totalorder %s610_s23, 0 }
   0x7   : > { %s27_s27 = sadd.s32 1, %s938_s19  ;;  %s945_s29 = smov [#allocation2]  }
   0x8   : > { %s1392_s24 = scalar_select %p1005_p2, 1, 0 }
   0x9   : > { %p1011_p3 = pnand %p611_p0, %p171_p1  ;;  %p1024_p6 = scmp.ge.s32.totalorder %s27_s27, 2 }
   0xa   : > { %s186_s30 = sshll.u32 %s945_s29, 4  ;;  %s798_s8 = scalar_lea.hbm %s1383_s1, 8192  ;;  %s187_s30 = int_to_ptr.vmem [resolvable:$true] %s186_s30 }
   0xb   : > { %s1393_s25 = scalar_select %p1011_p3, 1, 0 }
   0xc   : > { %p745_p4 = pneg %p1011_p3  ;;  %p799_p7 = scmp.ne.s32.totalorder %s1383_s1, %s798_s8 }
   0xd   : > { %p805_p11 = scmp.lt.u32.totalorder %s798_s8, %s1383_s1 }
   0xe   : > { %p1019_p5 = pnand %p1005_p2, %p745_p4 }
  0x10   : > { %p1036_p8 = pneg %p1019_p5 }
  0x12   : > { %p801_p9 = pnand %p1036_p8, %p799_p7 }
  0x14   : > { %p802_p10 = pneg %p801_p9 }
  0x16   : > { %p807_p12 = pnand %p805_p11, %p802_p10 }
  0x18   : > { %810 = shalt.err (!%p807_p12)
}
  0x19   : > { %s811_s14 = scalar_lea.vmem %s1009_s22, 8192  ;;  %p819_p4 = scmp.lt.s32.totalorder %s1009_s22, %s1009_s22 }
  0x1a   : > { %p812_p13 = scmp.ne.s32.totalorder %s1009_s22, %s811_s14  ;;  %p820_p2 = scmp.lt.s32.totalorder %s811_s14, %s811_s14 }
  0x1c   : > { %p814_p0 = pnand %p812_p13, %p1036_p8  ;;  %p821_p7 = por %p820_p2, %p819_p4 }
  0x1e   : > { %p815_p1 = pneg %p814_p0 }
  0x20   : > { %p822_p9 = pnand %p821_p7, %p815_p1 }
  0x22   : > { %825 = shalt.err (!%p822_p9)
}
  0x23   : > { %s946_s15 = smov 512   ;;  %s947_s16 = smov 32  }
  0x24   : > { %751 = dma.hbm_to_vmem [thread:$0]  (!%p1019_p5), %s1383_s1, 8192, %s1009_s22, [#allocation6], %s946_s15, %s946_s15, %s947_s16  }
  0x25   : > { %s1423_s27 = smov (%p1024_p6, %s27_s27), 0  ;;  %s826_s7 = scalar_lea.hbm %s1382_s0, 256 }
  0x26   : > { %p827_p2 = scmp.ne.s32.totalorder %s1382_s0, %s826_s7  ;;  %p833_p12 = scmp.lt.u32.totalorder %s826_s7, %s1382_s0 }
  0x28   : > { %p829_p10 = pnand %p827_p2, %p1036_p8 }
  0x2a   : > { %p830_p11 = pneg %p829_p10 }
  0x2c   : > { %p835_p13 = pnand %p833_p12, %p830_p11 }
  0x2e   : > { %838 = shalt.err (!%p835_p13)
}
  0x2f   : > { %s839_s22 = scalar_lea.vmem %s187_s30, 256  ;;  %p847_p4 = scmp.lt.s32.totalorder %s187_s30, %s187_s30 }
  0x30   : > { %p840_p6 = scmp.ne.s32.totalorder %s187_s30, %s839_s22  ;;  %p848_p7 = scmp.lt.s32.totalorder %s839_s22, %s839_s22 }
  0x32   : > { %p842_p0 = pnand %p840_p6, %p1036_p8  ;;  %p849_p9 = por %p848_p7, %p847_p4 }
  0x34   : > { %p843_p1 = pneg %p842_p0 }
  0x36   : > { %p850_p3 = pnand %p849_p9, %p843_p1 }
  0x38   : > { %853 = shalt.err (!%p850_p3)
}
  0x39   : > { %s948_s28 = smov 128   ;;  %s949_s13 = smov 8  }
  0x3a   : > { %748 = dma.hbm_to_vmem [thread:$0]  (!%p1019_p5), %s1382_s0, 256, %s187_s30, [#allocation3], %s948_s28, %s948_s28, %s949_s13  }
  0x3b   : > { %s950_s16 = smov [#allocation7]   ;;  %s854_s6 = scalar_lea.hbm %s1385_s3, 8192 }
  0x3c   : > { %s215_s17 = sshll.u32 %s950_s16, 4  ;;  %p855_p3 = scmp.ne.s32.totalorder %s1385_s3, %s854_s6  ;;  %s216_s17 = int_to_ptr.vmem [resolvable:$true] %s215_s17 }
  0x3d   : > { %p861_p11 = scmp.lt.u32.totalorder %s854_s6, %s1385_s3 }
  0x3e   : > { %p857_p2 = pnand %p855_p3, %p1036_p8 }
  0x40   : > { %p858_p10 = pneg %p857_p2 }
  0x42   : > { %p863_p12 = pnand %p861_p11, %p858_p10 }
  0x44   : > { %866 = shalt.err (!%p863_p12)
}
  0x45   : > { %s867_s30 = scalar_lea.vmem %s216_s17, 8192  ;;  %p875_p1 = scmp.lt.s32.totalorder %s216_s17, %s216_s17 }
  0x46   : > { %p868_p13 = scmp.ne.s32.totalorder %s216_s17, %s867_s30  ;;  %p876_p4 = scmp.lt.s32.totalorder %s867_s30, %s867_s30 }
  0x48   : > { %p870_p6 = pnand %p868_p13, %p1036_p8  ;;  %p877_p7 = por %p876_p4, %p875_p1 }
  0x4a   : > { %p871_p0 = pneg %p870_p6 }
  0x4c   : > { %p878_p9 = pnand %p877_p7, %p871_p0 }
  0x4e   : > { %881 = shalt.err (!%p878_p9)
}
  0x4f   : > { %754 = dma.hbm_to_vmem [thread:$0]  (!%p1019_p5), %s1385_s3, 8192, %s216_s17, [#allocation6], %s948_s28, %s948_s28, %s949_s13  }
  0x50   : > { %p1397_p3 = scmp.ne.s32.totalorder %s1393_s25, 0 }
  0x52   : > { %234 = sbr.rel (%p1397_p3) target bundleno = 612 (0x264), region = 40 }
  0x59   : > { %p1398_p2 = scmp.ne.s32.totalorder %s1392_s24, 0 }
  0x5b   : > { %921 = dma.done.wait (%p1398_p2), [#allocation3], 256  }
  0x5c   : > { %923 = vsyncadd (%p1398_p2), [#allocation3], 4294967040 }
  0x5d   : > { %925 = dma.done.wait (%p1398_p2), [#allocation6], 16384  }
  0x5e   : > { %927 = vsyncadd (%p1398_p2), [#allocation6], 4294950912  ;;  %s619_s26 = sshll.u32 %s934_s18, 8  ;;  %p621_p5 = scmp.ne.s32.totalorder %s934_s18, 0 }
  0x5f   : > { %s1110_s11 = sshra.s32 %s619_s26, 7  ;;  %s1219_s15 = scalar_lea.vmem [#allocation7], %s619_s26 }
  0x60   : > { %s620_s25 = sshll.u32 %s1110_s11, 3  ;;  %s299_s14 = scalar_lea.vmem %s1384_s2, %s1110_s11  ;;  %v302_v33 = vld [vmem:[%s1219_s15] sm:$0xff]  ;;  %v303_v34 = vld [vmem:[%s1219_s15 + $0x8] sm:$0xff]  ;;  %v304_v35 = vld [vmem:[%s1219_s15 + $0x10] sm:$0xff] }
  0x61   : > { %s1113_s28 = scalar_lea.vmem [#allocation5], %s620_s25  ;;  %v1215_v32 = vld [vmem:[%s299_s14] sm:$0x3]  ;;  %v305_v36 = vld [vmem:[%s1219_s15 + $0x18] sm:$0xff]  ;;  %v1229_v38 = vld [vmem:[%s1219_s15 + $0x28] sm:$0xff] }
  0x62   : > { %v1116_v0 = vld [vmem:[%s1113_s28] sm:$0xff]  ;;  %v1119_v1 = vld [vmem:[%s1113_s28 + $0x8] sm:$0xff]  ;;  %1401 = vst [vmem:[#allocation14_spill] sm:$0xff] %v1215_v32  ;;  %v1232_v39 = vld [vmem:[%s1219_s15 + $0x30] sm:$0xff] }
  0x63   : > { %v1122_v2 = vld [vmem:[%s1113_s28 + $0x20] sm:$0xff]  ;;  %v1125_v3 = vld [vmem:[%s1113_s28 + $0x28] sm:$0xff]  ;;  %v1235_v40 = vld [vmem:[%s1219_s15 + $0x38] sm:$0xff] }
  0x64   : > { %v1128_v4 = vld [vmem:[%s1113_s28 + $0x40] sm:$0xff]  ;;  %v1131_v5 = vld [vmem:[%s1113_s28 + $0x48] sm:$0xff]  ;;  %v1244_v43 = vld [vmem:[%s1219_s15 + $0x50] sm:$0xff] }
  0x65   : > { %v1134_v6 = vld [vmem:[%s1113_s28 + $0x60] sm:$0xff]  ;;  %v1137_v7 = vld [vmem:[%s1113_s28 + $0x68] sm:$0xff]  ;;  %v1247_v44 = vld [vmem:[%s1219_s15 + $0x58] sm:$0xff] }
  0x66   : > { %v1140_v8 = vld [vmem:[%s1113_s28 + $0x80] sm:$0xff]  ;;  %v1143_v9 = vld [vmem:[%s1113_s28 + $0x88] sm:$0xff]  ;;  %v1256_v47 = vld [vmem:[%s1219_s15 + $0x70] sm:$0xff] }
  0x67   : > { %v1146_v10 = vld [vmem:[%s1113_s28 + $0xa0] sm:$0xff]  ;;  %v1149_v11 = vld [vmem:[%s1113_s28 + $0xa8] sm:$0xff]  ;;  %1404 = vst [vmem:[#allocation17_spill] sm:$0xff] %v1256_v47  ;;  %v1259_v48 = vld [vmem:[%s1219_s15 + $0x78] sm:$0xff] }
  0x68   : > { %v1152_v12 = vld [vmem:[%s1113_s28 + $0xc0] sm:$0xff]  ;;  %v1155_v13 = vld [vmem:[%s1113_s28 + $0xc8] sm:$0xff]  ;;  %1405 = vst [vmem:[#allocation18_spill] sm:$0xff] %v1259_v48  ;;  %v320_v51 = vld [vmem:[%s1219_s15 + $0x90] sm:$0xff] }
  0x69   : > { %v1158_v14 = vld [vmem:[%s1113_s28 + $0xe0] sm:$0xff]  ;;  %v1161_v15 = vld [vmem:[%s1113_s28 + $0xe8] sm:$0xff]  ;;  %v321_v52 = vld [vmem:[%s1219_s15 + $0x98] sm:$0xff] }
  0x6a   : > { %v1164_v16 = vld [vmem:[%s1113_s28 + $0x100] sm:$0xff]  ;;  %v1167_v17 = vld [vmem:[%s1113_s28 + $0x108] sm:$0xff]  ;;  %v324_v55 = vld [vmem:[%s1219_s15 + $0xb0] sm:$0xff] }
  0x6b   : > { %v1170_v18 = vld [vmem:[%s1113_s28 + $0x120] sm:$0xff]  ;;  %v1173_v19 = vld [vmem:[%s1113_s28 + $0x128] sm:$0xff]  ;;  %v325_v56 = vld [vmem:[%s1219_s15 + $0xb8] sm:$0xff] }
  0x6c   : > { %v1176_v20 = vld [vmem:[%s1113_s28 + $0x140] sm:$0xff]  ;;  %v1179_v21 = vld [vmem:[%s1113_s28 + $0x148] sm:$0xff]  ;;  %v1272_v59 = vld [vmem:[%s1219_s15 + $0xd0] sm:$0xff] }
  0x6d   : > { %v1182_v22 = vld [vmem:[%s1113_s28 + $0x160] sm:$0xff]  ;;  %v1185_v23 = vld [vmem:[%s1113_s28 + $0x168] sm:$0xff]  ;;  %v1275_v60 = vld [vmem:[%s1219_s15 + $0xd8] sm:$0xff] }
  0x6e   : > { %v1192_v24 = vld [vmem:[%s1113_s28 + $0x180] sm:$0xff]  ;;  %v1195_v25 = vld [vmem:[%s1113_s28 + $0x188] sm:$0xff]  ;;  %v1284_v63 = vld [vmem:[%s1219_s15 + $0xf0] sm:$0xff] }
  0x6f   : > { %v1198_v26 = vld [vmem:[%s1113_s28 + $0x1a0] sm:$0xff]  ;;  %v1201_v27 = vld [vmem:[%s1113_s28 + $0x1a8] sm:$0xff]  ;;  %1407 = vst [vmem:[#allocation20_spill] sm:$0xff] %v1284_v63  ;;  %v1287_v32 = vld [vmem:[%s1219_s15 + $0xf8] sm:$0xff] }
  0x70   : > { %v1204_v28 = vld [vmem:[%s1113_s28 + $0x1c0] sm:$0xff]  ;;  %v1207_v29 = vld [vmem:[%s1113_s28 + $0x1c8] sm:$0xff]  ;;  %1408 = vst [vmem:[#allocation21_spill] sm:$0xff] %v1287_v32 }
  0x71   : > { %1399 = vst [vmem:[#allocation12_spill] sm:$0xff] %v1204_v28  ;;  %v1210_v30 = vld [vmem:[%s1113_s28 + $0x1e0] sm:$0xff]  ;;  %v1213_v31 = vld [vmem:[%s1113_s28 + $0x1e8] sm:$0xff] }
  0x72   : > { %1400 = vst [vmem:[#allocation13_spill] sm:$0xff] %v1210_v30  ;;  %v1226_v37 = vld [vmem:[%s1219_s15 + $0x20] sm:$0xff]  ;;  %v1241_v42 = vld [vmem:[%s1219_s15 + $0x48] sm:$0xff]  ;;  %337 = sbr.rel (%p621_p5) target bundleno = 123 (0x7b), region = 56 }
  0x73   : > { %v1238_v41 = vld [vmem:[%s1219_s15 + $0x40] sm:$0xff]  ;;  %v1253_v46 = vld [vmem:[%s1219_s15 + $0x68] sm:$0xff] }
  0x74   : > { %v1250_v45 = vld [vmem:[%s1219_s15 + $0x60] sm:$0xff]  ;;  %1403 = vst [vmem:[#allocation16_spill] sm:$0xff] %v1253_v46  ;;  %v319_v50 = vld [vmem:[%s1219_s15 + $0x88] sm:$0xff] }
  0x75   : > { %1402 = vst [vmem:[#allocation15_spill] sm:$0xff] %v1250_v45  ;;  %v318_v49 = vld [vmem:[%s1219_s15 + $0x80] sm:$0xff]  ;;  %v323_v54 = vld [vmem:[%s1219_s15 + $0xa8] sm:$0xff] }
  0x76   : > { %v322_v53 = vld [vmem:[%s1219_s15 + $0xa0] sm:$0xff]  ;;  %v327_v58 = vld [vmem:[%s1219_s15 + $0xc8] sm:$0xff] }
  0x77   : > { %v326_v57 = vld [vmem:[%s1219_s15 + $0xc0] sm:$0xff]  ;;  %v1281_v62 = vld [vmem:[%s1219_s15 + $0xe8] sm:$0xff] }
  0x78   : > { %v1278_v61 = vld [vmem:[%s1219_s15 + $0xe0] sm:$0xff]  ;;  %1406 = vst [vmem:[#allocation19_spill] sm:$0xff] %v1281_v62 }
  0x79   : > { %v622_v48 = vld [vmem:[%s1386_s4] ss:$0 sm:$0xff] }
  0x7a   : > { %345 = vst [vmem:[#allocation8] sm:$0xff] %v622_v48  ;;  %346 = vst [vmem:[#allocation8 + $0x8] sm:$0xff] %v622_v48 }
  0x7b PF: > { %v665_v47 = vpack.c.bf16 %v1125_v3, %v1119_v1  ;;  %v667_v46 = vpack.c.bf16 %v1122_v2, %v1116_v0  ;;  %v669_v63 = vpack.c.bf16 %v1137_v7, %v1131_v5  ;;  %v671_v32 = vpack.c.bf16 %v1134_v6, %v1128_v4  ;;  %s952_s18 = smov [#allocation8]   ;;  %p1347_p8 = scmp.eq.s32.totalorder %s610_s23, 1 }
  0x7c   : > { %v673_v45 = vpack.c.bf16 %v1149_v11, %v1143_v9  ;;  %v697_v48 = vpack.c.bf16 %v319_v50, %v318_v49  ;;  %v699_v30 = vpack.c.bf16 %v303_v34, %v302_v33  ;;  %v701_v28 = vpack.c.bf16 %v321_v52, %v320_v51  ;;  %v1417_v33 = vld [vmem:[#allocation18_spill] sm:$0xff]  ;;  %s531_s21 = sshll.u32 %s952_s18, 4  ;;  %s532_s21 = int_to_ptr.vmem [resolvable:$true] %s531_s21 }
  0x7d   : > { %666 = vmatprep.subr.bf16.mxu0 %v665_v47  ;;  %v951_v62 = vmov 0.0   ;;  %v675_v0 = vpack.c.bf16 %v1146_v10, %v1140_v8  ;;  %v703_v1 = vpack.c.bf16 %v305_v36, %v304_v35  ;;  %v677_v2 = vpack.c.bf16 %v1161_v15, %v1155_v13  ;;  %s882_s6 = scalar_lea.vmem %s532_s21, 256  ;;  %p889_p13 = scmp.lt.s32.totalorder %s532_s21, %s532_s21 }
  0x7e   : > { %668 = vmatpush1.bf16.msra.mxu0 %v667_v46  ;;  %424 = vmatprep.mubr.f32.mxu0 %v951_v62  ;;  %v705_v3 = vpack.c.bf16 %v323_v54, %v322_v53  ;;  %v679_v4 = vpack.c.bf16 %v1158_v14, %v1152_v12  ;;  %v707_v5 = vpack.c.bf16 %v1229_v38, %v1226_v37  ;;  %v350_v35 = vlaneseq  ;;  %p883_p10 = scmp.ne.s32.totalorder %s532_s21, %s882_s6  ;;  %p890_p6 = scmp.lt.s32.totalorder %s882_s6, %s882_s6 }
  0x7f   : > { %670 = vmatprep.subr.bf16.mxu0 %v669_v63  ;;  %698 = vmatprep.subr.bf16.mxu1 %v697_v48  ;;  %v681_v6 = vpack.c.bf16 %v1173_v19, %v1167_v17  ;;  %v709_v7 = vpack.c.bf16 %v325_v56, %v324_v55  ;;  %v683_v8 = vpack.c.bf16 %v1170_v18, %v1164_v16 }
  0x80   : > { %700 = vmatpush3.bf16.msra.mxu1 %v699_v30  ;;  %v711_v9 = vpack.c.bf16 %v1235_v40, %v1232_v39  ;;  %v685_v10 = vpack.c.bf16 %v1185_v23, %v1179_v21  ;;  %v713_v11 = vpack.c.bf16 %v327_v58, %v326_v57  ;;  %v687_v12 = vpack.c.bf16 %v1182_v22, %v1176_v20  ;;  %v1410_v21 = vld [vmem:[#allocation12_spill] sm:$0xff]  ;;  %v1411_v22 = vld [vmem:[#allocation13_spill] sm:$0xff]  ;;  %v1418_v39 = vld [vmem:[#allocation14_spill] sm:$0xff]  ;;  %p884_p11 = pnand %p883_p10, %p1347_p8  ;;  %p891_p0 = por %p890_p6, %p889_p13 }
  0x81   : > { %702 = vmatprep.subr.bf16.mxu1 %v701_v28  ;;  %v715_v13 = vpack.c.bf16 %v1241_v42, %v1238_v41  ;;  %v689_v14 = vpack.c.bf16 %v1201_v27, %v1195_v25  ;;  %v717_v15 = vpack.c.bf16 %v1275_v60, %v1272_v59  ;;  %v691_v16 = vpack.c.bf16 %v1198_v26, %v1192_v24  ;;  %v1409_v19 = vld [vmem:[#allocation19_spill] sm:$0xff]  ;;  %v347_v24 = vld [vmem:[#allocation2] sm:$0xff]  ;;  %v348_v25 = vld [vmem:[#allocation2 + $0x8] sm:$0xff] }
  0x82   : > { %672 = vmatpush1.bf16.msra.mxu0 %v671_v32  ;;  %v719_v17 = vpack.c.bf16 %v1247_v44, %v1244_v43  ;;  %v693_v18 = vpack.c.bf16 %v1213_v31, %v1207_v29  ;;  %v721_v20 = vpack.c.bf16 %v1409_v19, %v1278_v61  ;;  %v695_v23 = vpack.c.bf16 %v1411_v22, %v1410_v21  ;;  %v1412_v26 = vld [vmem:[#allocation15_spill] sm:$0xff]  ;;  %v1413_v27 = vld [vmem:[#allocation16_spill] sm:$0xff]  ;;  %v1415_v30 = vld [vmem:[#allocation21_spill] sm:$0xff]  ;;  %p885_p12 = pneg %p884_p11 }
  0x83   : > { %674 = vmatprep.subr.bf16.mxu0 %v673_v45  ;;  %v723_v28 = vpack.c.bf16 %v1413_v27, %v1412_v26  ;;  %v1414_v29 = vld [vmem:[#allocation20_spill] sm:$0xff]  ;;  %v1416_v32 = vld [vmem:[#allocation17_spill] sm:$0xff]  ;;  %v351_v36 = vshrl.u32 %v350_v35, 7  ;;  %v441_v56 = vld [vmem:[#allocation8] sm:$0xff] }
  0x84   : > { %704 = vmatpush3.bf16.msra.mxu1 %v703_v1  ;;  %v725_v31 = vpack.c.bf16 %v1415_v30, %v1414_v29  ;;  %v727_v34 = vpack.c.bf16 %v1417_v33, %v1416_v32  ;;  %v442_v61 = vld [vmem:[#allocation8 + $0x8] sm:$0xff]  ;;  %p892_p1 = pnand %p891_p0, %p885_p12 }
  0x85   : > { %706 = vmatprep.subr.bf16.mxu1 %v705_v3  ;;  %v352_v37 = vsub.s32 0, %v351_v36  ;;  %v356_v38 = vsub.s32 1, %v351_v36 }
  0x86   : > { %676 = vmatpush1.bf16.msra.mxu0 %v675_v0 }
  0x87   : > { %678 = vmatprep.subr.bf16.mxu0 %v677_v2  ;;  %v353_v40 = vrot.slane %v1418_v39, %v352_v37  ;;  %v357_v41 = vrot.slane %v1418_v39, %v356_v38 }
  0x88   : > { %708 = vmatpush3.bf16.msra.mxu1 %v707_v5 }
  0x89   : > { %710 = vmatprep.subr.bf16.mxu1 %v709_v7 }
  0x8a   : > { %680 = vmatpush1.bf16.msra.mxu0 %v679_v4 }
  0x8b   : > { %682 = vmatprep.subr.bf16.mxu0 %v681_v6 }
  0x8c   : > { %712 = vmatpush3.bf16.msra.mxu1 %v711_v9 }
  0x8d   : > { %714 = vmatprep.subr.bf16.mxu1 %v713_v11 }
  0x8e   : > { %684 = vmatpush1.bf16.msra.mxu0 %v683_v8 }
  0x8f   : > { %686 = vmatprep.subr.bf16.mxu0 %v685_v10 }
  0x90   : > { %716 = vmatpush3.bf16.msra.mxu1 %v715_v13 }
  0x91   : > { %718 = vmatprep.subr.bf16.mxu1 %v717_v15 }
  0x92   : > { %688 = vmatpush1.bf16.msra.mxu0 %v687_v12 }
  0x93   : > { %690 = vmatprep.subr.bf16.mxu0 %v689_v14 }
  0x94   : > { %720 = vmatpush3.bf16.msra.mxu1 %v719_v17 }
  0x95   : > { %722 = vmatprep.subr.bf16.mxu1 %v721_v20 }
  0x96   : > { %692 = vmatpush1.bf16.msra.mxu0 %v691_v16 }
  0x97   : > { %694 = vmatprep.subr.bf16.mxu0 %v693_v18 }
  0x98   : > { %724 = vmatpush3.bf16.msra.mxu1 %v723_v28 }
  0x99   : > { %726 = vmatprep.subr.bf16.mxu1 %v725_v31 }
  0x9a   : > { %696 = vmatpush1.bf16.msra.mxu0 %v695_v23 }
  0x9c   : > { %728 = vmatpush3.bf16.msra.mxu1 %v727_v34 }
  0x9d   : > { %425 = vmatmul.mubr.f32.vlgmr.msra.gmra.mrb[0].mxu0 %v347_v24 }
  0x9e   : > { %430 = vmatprep.mubr.f32.mxu0 %v951_v62 }
  0xa1   : > { %431 = vmatmul.mubr.f32.gmra.mrb[2].mxu0 %v348_v25 }
 0x170   : > { %v426_v42 = vpop.f32.mrb[0].mxu0 }
 0x171   : > { %v427_v43 = vadd.f32 %v426_v42, %v353_v40  ;;  %v428_v44 = vpop.f32.mrb[1].mxu0 }
 0x172   : > { %v429_v45 = vadd.f32 %v428_v44, %v357_v41 }
 0x173   : > { %v437_v49 = vmax.f32 %v427_v43, 0.0 }
 0x174   : > { %v432_v46 = vpop.f32.mrb[2].mxu0  ;;  %v438_v47 = vmax.f32 %v429_v45, 0.0 }
 0x175   : > { %v433_v50 = vadd.f32 %v432_v46, %v353_v40  ;;  %v434_v51 = vpop.f32.mrb[3].mxu0 }
 0x176   : > { %v435_v52 = vadd.f32 %v434_v51, %v357_v41  ;;  %507 = vmatprep.mubr.f32.mxu1 %v438_v47 }
 0x177   : > { %508 = vmatmul.mubr.f32.vlgmr.msra.gmra.mrb[0].mxu1 %v437_v49  ;;  %v439_v54 = vmax.f32 %v433_v50, 0.0 }
 0x178   : > { %v440_v53 = vmax.f32 %v435_v52, 0.0 }
 0x17a   : > { %512 = vmatprep.mubr.f32.mxu1 %v440_v53 }
 0x17b   : > { %513 = vmatmul.mubr.f32.gmra.mrb[2].mxu1 %v439_v54 }
 0x24a   : > { %v659_v55 = vpop.f32.mrb[0].mxu1 }
 0x24b   : > { %v660_v57 = vpop.f32.mrb[1].mxu1 }
 0x24c   : > { %v661_v58 = vadd.f32 %v660_v57, %v659_v55 }
 0x24e   : > { %v518_v59 = vadd.f32 %v661_v58, %v441_v56  ;;  %v662_v60 = vpop.f32.mrb[2].mxu1 }
 0x24f   : > { %v663_v62 = vpop.f32.mrb[3].mxu1 }
 0x250   : > { %520 = vst [vmem:[#allocation8] sm:$0xff] %v518_v59  ;;  %v664_v63 = vadd.f32 %v663_v62, %v662_v60 }
 0x252   : > { %v519_v48 = vadd.f32 %v664_v63, %v442_v61 }
 0x254   : > { %521 = vst [vmem:[#allocation8 + $0x8] sm:$0xff] %v519_v48 }
 0x255   : > { %895 = shalt.err (!%p892_p1)
}
 0x256   : > { %s896_s23 = scalar_lea.hbm %s1387_s5, 256 }
 0x257   : > { %p897_p4 = scmp.ne.s32.totalorder %s1387_s5, %s896_s23  ;;  %p902_p3 = scmp.lt.u32.totalorder %s896_s23, %s1387_s5 }
 0x259   : > { %p898_p7 = pnand %p897_p4, %p1347_p8 }
 0x25b   : > { %p899_p9 = pneg %p898_p7 }
 0x25d   : > { %p904_p2 = pnand %p902_p3, %p899_p9 }
 0x25f   : > { %907 = shalt.err (!%p904_p2)
}
 0x260   : > { %s953_s22 = smov 128   ;;  %s954_s26 = smov 8  }
 0x261   : > { %742 = dma.vmem_to_hbm [thread:$0]  (%p1347_p8), %s532_s21, 256, %s1387_s5, [#allocation4], %s953_s22, %s953_s22, %s954_s26  }
 0x262   : > { %929 = dma.done.wait (%p1347_p8), [#allocation4], 256  }
 0x263   : > { %931 = vsyncadd (%p1347_p8), [#allocation4], 4294967040 }
 0x264 PF: > { %s18_s20 = sadd.s32 1, %s942_s20   ;;  %s1420_s18 = smov %s938_s19 }
 0x265   : > { %p15_p5 = scmp.ge.s32.totalorder %s18_s20, 4   ;;  %s1421_s19 = smov %s1423_s27 }
 0x267   :  { %17 = sbr.rel (!%p15_p5) target bundleno = 4 (0x4), region = 86 }
 0x26e   :  { %547 = vsyncpa [#allocation3], 1 }
 0x26f   :  { %549 = vsyncpa [#allocation3 + $0x1], 1 }
 0x270   :  { %550 = vsyncpa [#allocation6], 1 }
 0x271   :  { %551 = vsyncpa [#allocation4], 1 }
 0x272   :  { %553 = vsyncpa [#allocation4 + $0x1], 1 }

</bundles_post_ra>
